<compile_context>
chip_gen: v5e
topology: v5e:2x2
jax: 0.10.0
libtpu: 0.0.40
codegen_flags: <defaults>
</compile_context>

<pallas_src>
import functools

import jax
import jax.numpy as jnp
from jax.experimental import pallas as pl
from jax.experimental.pallas import tpu as pltpu


def _fused_vae_kernel(x_ref, eps_ref,
                      wh_ref, bh_ref,
                      wmv_ref, bmv_ref,
                      wdh_ref, bdh_ref,
                      wdm_ref, bdm_ref,
                      z_ref, loss_ref,
                      *, latent_dim):
    x = x_ref[...]          # [2N, D]
    eps = eps_ref[...]      # [2N, L]

    # ---- encoder ----
    h = jnp.dot(x, wh_ref[...], preferred_element_type=jnp.float32) + bh_ref[...]
    h = jnp.maximum(h, 0.0)                                        # ReLU
    # fused fc_mu / fc_var: one matmul, split with static lane slices
    muvar = jnp.dot(h, wmv_ref[...], preferred_element_type=jnp.float32) + bmv_ref[...]
    mu = muvar[:, :latent_dim]
    logvar = muvar[:, latent_dim:]

    # ---- reparameterize: z = eps * exp(0.5*logvar) + mu ----
    std = jnp.exp(0.5 * logvar)
    var = std * std                      # == exp(logvar), saves one EUP transcendental
    z = eps * std + mu
    z_ref[...] = z

    # ---- decoder ----
    dh = jnp.dot(z, wdh_ref[...], preferred_element_type=jnp.float32) + bdh_ref[...]
    dh = jnp.maximum(dh, 0.0)                                      # ReLU
    logits = jnp.dot(dh, wdm_ref[...], preferred_element_type=jnp.float32) + bdm_ref[...]
    recon = jax.nn.sigmoid(logits)                                 # Sigmoid

    # ---- losses, fused over both passes ----
    # 0.5*(mse_e1 + mse_e2) == mean(sq) over all 2N rows (both batches have N rows).
    # 0.5*(kld_e1 + kld_e2) == mean(kld_rows) over all 2N rows.
    diff = recon - x
    sq = diff * diff
    kld_rows = -0.5 * jnp.sum(1.0 + logvar - mu * mu - var,
                              axis=1, keepdims=True)               # [2N, 1]
    loss_ref[0, 0] = jnp.mean(sq) + jnp.mean(kld_rows)


def simple_topic_model_forward(batch_e1_inputs, batch_e2_inputs, eps_e1, eps_e2, params):
    """Forward pass of SimpleTopicModel (batch_mask=None case).

    Returns (loss, z_e1, z_e2) mirroring the PyTorch module.
    """
    # TODO(synk): batch_mask boolean-gather path (data-dependent row select) not
    # implemented; this corresponds to the batch_mask=None branch.
    N, D = batch_e1_inputs.shape
    L = eps_e1.shape[1]
    I = params["W_h"].shape[1]
    M = 2 * N

    # Concatenate the two passes in XLA (cheap): every in-kernel matmul runs once
    # at M = 2N rows and the kernel sees a single contiguous x / eps / z stream.
    x = jnp.concatenate([batch_e1_inputs, batch_e2_inputs], axis=0)   # [2N, D]
    eps = jnp.concatenate([eps_e1, eps_e2], axis=0)                   # [2N, L]

    vmem = pl.BlockSpec(memory_space=pltpu.VMEM)
    smem = pl.BlockSpec(memory_space=pltpu.SMEM)

    flops = 2 * M * (D * I + I * (2 * L) + L * I + I * D)
    transcendentals = M * (L + D)          # one exp per latent elem + sigmoid per output elem
    bytes_accessed = 4 * (
        M * D + M * L                                                 # x, eps
        + D * I + I + I * (2 * L) + 2 * L + L * I + I + I * D + D     # weights + biases
        + M * L + 1                                                   # z, loss
    )

    z, loss = pl.pallas_call(
        functools.partial(_fused_vae_kernel, latent_dim=L),
        out_shape=(
            jax.ShapeDtypeStruct((M, L), jnp.float32),   # z  (e1 rows then e2 rows)
            jax.ShapeDtypeStruct((1, 1), jnp.float32),   # fused scalar loss
        ),
        in_specs=[vmem] * 10,
        out_specs=(vmem, smem),
        cost_estimate=pl.CostEstimate(flops=flops,
                                      transcendentals=transcendentals,
                                      bytes_accessed=bytes_accessed),
    )(x, eps,
      params["W_h"], params["b_h"],
      params["W_muvar"], params["b_muvar"],
      params["W_dh"], params["b_dh"],
      params["W_dm"], params["b_dm"])

    z_e1 = z[:N]
    z_e2 = z[N:]
    return loss[0, 0], z_e1, z_e2


def init_params(key, original_dim, inter_dim, latent_dim):
    """Deterministic parameter init. Weights stored as [in, out]; fc_mu/fc_var pre-fused."""
    ks = jax.random.split(key, 5)
    s = 0.05

    def lin(k, fan_in, fan_out):
        return s * jax.random.normal(k, (fan_in, fan_out), jnp.float32)

    return {
        "W_h":     lin(ks[0], original_dim, inter_dim),
        "b_h":     jnp.zeros((1, inter_dim), jnp.float32),
        # fc_mu and fc_var fused along the output-feature axis:
        #   [:, :latent_dim] -> mu,  [:, latent_dim:] -> logvar
        "W_muvar": jnp.concatenate([lin(ks[1], inter_dim, latent_dim),
                                    lin(ks[2], inter_dim, latent_dim)], axis=1),
        "b_muvar": jnp.zeros((1, 2 * latent_dim), jnp.float32),
        "W_dh":    lin(ks[3], latent_dim, inter_dim),
        "b_dh":    jnp.zeros((1, inter_dim), jnp.float32),
        "W_dm":    lin(ks[4], inter_dim, original_dim),
        "b_dm":    jnp.zeros((1, original_dim), jnp.float32),
    }


def _reference_forward(x1, x2, e1, e2, p):
    """Pure-JAX reference of the PyTorch module (batch_mask=None)."""
    L = e1.shape[1]

    def encode(x):
        h = jax.nn.relu(x @ p["W_h"] + p["b_h"])
        mv = h @ p["W_muvar"] + p["b_muvar"]
        return mv[:, :L], mv[:, L:]

    def decode(z):
        dh = jax.nn.relu(z @ p["W_dh"] + p["b_dh"])
        return jax.nn.sigmoid(dh @ p["W_dm"] + p["b_dm"])

    def one(x, e):
        mu, lv = encode(x)
        z = e * jnp.exp(0.5 * lv) + mu
        r = decode(z)
        mse = jnp.mean((r - x) ** 2)
        kld = jnp.mean(-0.5 * jnp.sum(1.0 + lv - mu * mu - jnp.exp(lv), axis=1))
        return z, mse, kld

    z1, m1, k1 = one(x1, e1)
    z2, m2, k2 = one(x2, e2)
    return 0.5 * (m1 + k1) + 0.5 * (m2 + k2), z1, z2


if __name__ == "__main__":
    # Small shapes implied by the module: args.dist_dim, args.topic_inter_map, args.topic_dim
    N = 8              # flattened batch (batch * seq in the original usage)
    ORIGINAL_DIM = 64  # args.dist_dim
    INTER_DIM = 128    # args.topic_inter_map
    LATENT_DIM = 32    # args.topic_dim

    key = jax.random.PRNGKey(0)
    k_p, k_x1, k_x2, k_e1, k_e2 = jax.random.split(key, 5)

    params = init_params(k_p, ORIGINAL_DIM, INTER_DIM, LATENT_DIM)

    batch_e1 = jax.random.uniform(k_x1, (N, ORIGINAL_DIM), jnp.float32)
    batch_e2 = jax.random.uniform(k_x2, (N, ORIGINAL_DIM), jnp.float32)
    # eps for reparameterization (deterministic stand-in for torch.randn_like)
    eps_e1 = jax.random.normal(k_e1, (N, LATENT_DIM), jnp.float32)
    eps_e2 = jax.random.normal(k_e2, (N, LATENT_DIM), jnp.float32)

    fwd = jax.jit(simple_topic_model_forward)
    loss, z_e1, z_e2 = fwd(batch_e1, batch_e2, eps_e1, eps_e2, params)
    jax.block_until_ready((loss, z_e1, z_e2))

    # correctness check against a pure-JAX reference
    loss_r, z1_r, z2_r = _reference_forward(batch_e1, batch_e2, eps_e1, eps_e2, params)
    assert jnp.allclose(loss, loss_r, rtol=1e-4, atol=1e-5), (loss, loss_r)
    assert jnp.allclose(z_e1, z1_r, rtol=1e-4, atol=1e-5)
    assert jnp.allclose(z_e2, z2_r, rtol=1e-4, atol=1e-5)

    assert z_e1.shape == (N, LATENT_DIM) and z_e2.shape == (N, LATENT_DIM)
    assert loss.shape == ()
    print("KERNEL_OK")
</pallas_src>

<mosaic_0001>
module attributes {stable_mosaic.version = 11 : i64} {
  func.func @_fused_vae_kernel(%arg0: memref<16x64xf32, #tpu.memory_space<vmem>>, %arg1: memref<16x32xf32, #tpu.memory_space<vmem>>, %arg2: memref<64x128xf32, #tpu.memory_space<vmem>>, %arg3: memref<1x128xf32, #tpu.memory_space<vmem>>, %arg4: memref<128x64xf32, #tpu.memory_space<vmem>>, %arg5: memref<1x64xf32, #tpu.memory_space<vmem>>, %arg6: memref<32x128xf32, #tpu.memory_space<vmem>>, %arg7: memref<1x128xf32, #tpu.memory_space<vmem>>, %arg8: memref<128x64xf32, #tpu.memory_space<vmem>>, %arg9: memref<1x64xf32, #tpu.memory_space<vmem>>, %arg10: memref<16x32xf32, #tpu.memory_space<vmem>>, %arg11: memref<1x1xf32, #tpu.memory_space<smem>>) attributes {dimension_semantics = [], scalar_prefetch = 0 : i64, scratch_operands = 0 : i64, tpu.core_type = #tpu.core_type<tc>} {
    %c0 = arith.constant 0 : index
    %c0_0 = arith.constant 0 : index
    %0 = vector.load %arg0[%c0, %c0_0] : memref<16x64xf32, #tpu.memory_space<vmem>>, vector<16x64xf32>
    %c0_1 = arith.constant 0 : index
    %c0_2 = arith.constant 0 : index
    %1 = vector.load %arg1[%c0_1, %c0_2] : memref<16x32xf32, #tpu.memory_space<vmem>>, vector<16x32xf32>
    %c0_3 = arith.constant 0 : index
    %c0_4 = arith.constant 0 : index
    %2 = vector.load %arg2[%c0_3, %c0_4] : memref<64x128xf32, #tpu.memory_space<vmem>>, vector<64x128xf32>
    %cst = arith.constant dense<0.000000e+00> : vector<16x128xf32>
    %3 = tpu.matmul %0, %2, %cst {dimension_numbers = #tpu.dot_dimension_numbers<[1], [0], [0], [1], [0, 0, 1, 1], [], []>} : vector<16x64xf32>, vector<64x128xf32>, vector<16x128xf32> -> vector<16x128xf32>
    %c0_5 = arith.constant 0 : index
    %c0_6 = arith.constant 0 : index
    %4 = vector.load %arg3[%c0_5, %c0_6] : memref<1x128xf32, #tpu.memory_space<vmem>>, vector<1x128xf32>
    %5 = vector.broadcast %4 : vector<1x128xf32> to vector<16x128xf32>
    %6 = arith.addf %3, %5 : vector<16x128xf32>
    %cst_7 = arith.constant 0.000000e+00 : f32
    %7 = vector.broadcast %cst_7 : f32 to vector<16x128xf32>
    %8 = arith.maximumf %6, %7 : vector<16x128xf32>
    %c0_8 = arith.constant 0 : index
    %c0_9 = arith.constant 0 : index
    %9 = vector.load %arg4[%c0_8, %c0_9] : memref<128x64xf32, #tpu.memory_space<vmem>>, vector<128x64xf32>
    %cst_10 = arith.constant dense<0.000000e+00> : vector<16x64xf32>
    %10 = tpu.matmul %8, %9, %cst_10 {dimension_numbers = #tpu.dot_dimension_numbers<[1], [0], [0], [1], [0, 0, 1, 1], [], []>} : vector<16x128xf32>, vector<128x64xf32>, vector<16x64xf32> -> vector<16x64xf32>
    %c0_11 = arith.constant 0 : index
    %c0_12 = arith.constant 0 : index
    %11 = vector.load %arg5[%c0_11, %c0_12] : memref<1x64xf32, #tpu.memory_space<vmem>>, vector<1x64xf32>
    %12 = vector.broadcast %11 : vector<1x64xf32> to vector<16x64xf32>
    %13 = arith.addf %10, %12 : vector<16x64xf32>
    %14 = vector.extract_strided_slice %13 {offsets = [0, 0], sizes = [16, 32], strides = [1, 1]} : vector<16x64xf32> to vector<16x32xf32>
    %15 = vector.extract_strided_slice %13 {offsets = [0, 32], sizes = [16, 32], strides = [1, 1]} : vector<16x64xf32> to vector<16x32xf32>
    %cst_13 = arith.constant 5.000000e-01 : f32
    %16 = vector.broadcast %cst_13 : f32 to vector<16x32xf32>
    %17 = arith.mulf %16, %15 : vector<16x32xf32>
    %18 = math.exp %17 : vector<16x32xf32>
    %19 = arith.mulf %18, %18 : vector<16x32xf32>
    %20 = arith.mulf %1, %18 : vector<16x32xf32>
    %21 = arith.addf %20, %14 : vector<16x32xf32>
    %c0_14 = arith.constant 0 : index
    %c0_15 = arith.constant 0 : index
    %22 = vector.load %arg10[%c0_14, %c0_15] : memref<16x32xf32, #tpu.memory_space<vmem>>, vector<16x32xf32>
    tpu.vector_store %arg10[%c0_14, %c0_15], %21 {strides = array<i32>} : memref<16x32xf32, #tpu.memory_space<vmem>>, vector<16x32xf32>,
    %c0_16 = arith.constant 0 : index
    %c0_17 = arith.constant 0 : index
    %23 = vector.load %arg6[%c0_16, %c0_17] : memref<32x128xf32, #tpu.memory_space<vmem>>, vector<32x128xf32>
    %cst_18 = arith.constant dense<0.000000e+00> : vector<16x128xf32>
    %24 = tpu.matmul %21, %23, %cst_18 {dimension_numbers = #tpu.dot_dimension_numbers<[1], [0], [0], [1], [0, 0, 1, 1], [], []>} : vector<16x32xf32>, vector<32x128xf32>, vector<16x128xf32> -> vector<16x128xf32>
    %c0_19 = arith.constant 0 : index
    %c0_20 = arith.constant 0 : index
    %25 = vector.load %arg7[%c0_19, %c0_20] : memref<1x128xf32, #tpu.memory_space<vmem>>, vector<1x128xf32>
    %26 = vector.broadcast %25 : vector<1x128xf32> to vector<16x128xf32>
    %27 = arith.addf %24, %26 : vector<16x128xf32>
    %cst_21 = arith.constant 0.000000e+00 : f32
    %28 = vector.broadcast %cst_21 : f32 to vector<16x128xf32>
    %29 = arith.maximumf %27, %28 : vector<16x128xf32>
    %c0_22 = arith.constant 0 : index
    %c0_23 = arith.constant 0 : index
    %30 = vector.load %arg8[%c0_22, %c0_23] : memref<128x64xf32, #tpu.memory_space<vmem>>, vector<128x64xf32>
    %cst_24 = arith.constant dense<0.000000e+00> : vector<16x64xf32>
    %31 = tpu.matmul %29, %30, %cst_24 {dimension_numbers = #tpu.dot_dimension_numbers<[1], [0], [0], [1], [0, 0, 1, 1], [], []>} : vector<16x128xf32>, vector<128x64xf32>, vector<16x64xf32> -> vector<16x64xf32>
    %c0_25 = arith.constant 0 : index
    %c0_26 = arith.constant 0 : index
    %32 = vector.load %arg9[%c0_25, %c0_26] : memref<1x64xf32, #tpu.memory_space<vmem>>, vector<1x64xf32>
    %33 = vector.broadcast %32 : vector<1x64xf32> to vector<16x64xf32>
    %34 = arith.addf %31, %33 : vector<16x64xf32>
    %35 = arith.negf %34 : vector<16x64xf32>
    %36 = math.exp %35 : vector<16x64xf32>
    %cst_27 = arith.constant 1.000000e+00 : f32
    %37 = vector.broadcast %cst_27 : f32 to vector<16x64xf32>
    %38 = arith.addf %37, %36 : vector<16x64xf32>
    %39 = arith.divf %37, %38 : vector<16x64xf32>
    %40 = arith.subf %39, %0 : vector<16x64xf32>
    %41 = arith.mulf %40, %40 : vector<16x64xf32>
    %cst_28 = arith.constant 1.000000e+00 : f32
    %42 = vector.broadcast %cst_28 : f32 to vector<16x32xf32>
    %43 = arith.addf %42, %15 : vector<16x32xf32>
    %44 = arith.mulf %14, %14 : vector<16x32xf32>
    %45 = arith.subf %43, %44 : vector<16x32xf32>
    %46 = arith.subf %45, %19 : vector<16x32xf32>
    %cst_29 = arith.constant dense<0.000000e+00> : vector<16xf32>
    %47 = vector.multi_reduction <add>, %46, %cst_29 [1] : vector<16x32xf32> to vector<16xf32>
    %48 = vector.shape_cast %47 : vector<16xf32> to vector<16x1xf32>
    %cst_30 = arith.constant -5.000000e-01 : f32
    %49 = vector.broadcast %cst_30 : f32 to vector<16x1xf32>
    %50 = arith.mulf %49, %48 : vector<16x1xf32>
    %51 = vector.shape_cast %41 : vector<16x64xf32> to vector<1x16x64xf32>
    %cst_31 = arith.constant dense<0.000000e+00> : vector<1xf32>
    %52 = vector.multi_reduction <add>, %51, %cst_31 [1, 2] : vector<1x16x64xf32> to vector<1xf32>
    %53 = vector.shape_cast %52 : vector<1xf32> to vector<1x1x1xf32>
    %54 = vector.extract %53[0, 0, 0] : f32 from vector<1x1x1xf32>
    %cst_32 = arith.constant 1.024000e+03 : f32
    %55 = arith.divf %54, %cst_32 : f32
    %56 = vector.shape_cast %50 : vector<16x1xf32> to vector<1x16x1xf32>
    %cst_33 = arith.constant dense<0.000000e+00> : vector<1xf32>
    %57 = vector.multi_reduction <add>, %56, %cst_33 [1, 2] : vector<1x16x1xf32> to vector<1xf32>
    %58 = vector.shape_cast %57 : vector<1xf32> to vector<1x1x1xf32>
    %59 = vector.extract %58[0, 0, 0] : f32 from vector<1x1x1xf32>
    %cst_34 = arith.constant 1.600000e+01 : f32
    %60 = arith.divf %59, %cst_34 : f32
    %61 = arith.addf %55, %60 : f32
    %c0_35 = arith.constant 0 : index
    %c0_36 = arith.constant 0 : index
    %62 = memref.load %arg11[%c0_35, %c0_36] : memref<1x1xf32, #tpu.memory_space<smem>>
    memref.store %61, %arg11[%c0_35, %c0_36] : memref<1x1xf32, #tpu.memory_space<smem>>
    return
  }
}

</mosaic_0001>

<bundles_post_ra>
// kernel: simple_topic_model_forward.1
= control target key start
LH: loop header
LB: loop body
LE: loop exit
PB: predicated region body
PF: predicated region fallthrough
CT: control target
= control target key end

     0   :  { %s674_s0 = inlined_call_operand.vmem [shape: f32[16,64], index: 0, kind: input, shape index: {}]   ;;  %s675_s1 = inlined_call_operand.vmem [shape: f32[16,32], index: 1, kind: input, shape index: {}]   ;;  %s676_s2 = inlined_call_operand.vmem [shape: f32[64,128], index: 2, kind: input, shape index: {}]   ;;  %s677_s3 = inlined_call_operand.vmem [shape: f32[1,128], index: 3, kind: input, shape index: {}]   ;;  %s678_s4 = inlined_call_operand.vmem [shape: f32[128,64], index: 4, kind: input, shape index: {}]   ;;  %s679_s5 = inlined_call_operand.vmem [shape: f32[1,64], index: 5, kind: input, shape index: {}]   ;;  %s680_s6 = inlined_call_operand.vmem [shape: f32[32,128], index: 6, kind: input, shape index: {}]   ;;  %s681_s7 = inlined_call_operand.vmem [shape: f32[1,128], index: 7, kind: input, shape index: {}]   ;;  %s682_s8 = inlined_call_operand.vmem [shape: f32[128,64], index: 8, kind: input, shape index: {}]   ;;  %s683_s9 = inlined_call_operand.vmem [shape: f32[1,64], index: 9, kind: input, shape index: {}]   ;;  %s684_s10 = inlined_call_operand.vmem [shape: f32[16,32], index: 10, kind: output, shape index: {0}]   ;;  %s685_s11 = inlined_call_operand.hbm [shape: f32[1,1], index: 11, kind: output, shape index: {1}]  }
   0x1   :  { %v49_v0 = vld [vmem:[%s676_s2 + $0x38] sm:$0xff]  ;;  %v48_v1 = vld [vmem:[%s676_s2 + $0x30] sm:$0xff]  ;;  %v47_v2 = vld [vmem:[%s676_s2 + $0x28] sm:$0xff] }
   0x2   :  { %69 = vmatpush.msra.mxu0 %v49_v0  ;;  %v101_v3 = vld [vmem:[%s678_s4 + $0x78] sm:$0xff]  ;;  %v100_v4 = vld [vmem:[%s678_s4 + $0x70] sm:$0xff]  ;;  %v46_v5 = vld [vmem:[%s676_s2 + $0x20] sm:$0xff] }
   0x3   :  { %106 = vmatpush.msra.mxu1 %v101_v3  ;;  %v99_v6 = vld [vmem:[%s678_s4 + $0x68] sm:$0xff]  ;;  %v45_v7 = vld [vmem:[%s676_s2 + $0x18] sm:$0xff]  ;;  %v98_v8 = vld [vmem:[%s678_s4 + $0x60] sm:$0xff] }
   0x4   :  { %70 = vmatpush.msra.mxu0 %v48_v1  ;;  %v44_v9 = vld [vmem:[%s676_s2 + $0x10] sm:$0xff]  ;;  %v97_v10 = vld [vmem:[%s678_s4 + $0x58] sm:$0xff] }
   0x5   :  { %107 = vmatpush.msra.mxu1 %v100_v4 }
   0x6   :  { %71 = vmatpush.msra.mxu0 %v47_v2 }
   0x7   :  { %108 = vmatpush.msra.mxu1 %v99_v6 }
   0x8   :  { %72 = vmatpush.msra.mxu0 %v46_v5 }
   0xa   :  { %73 = vmatpush.msra.mxu0 %v45_v7 }
   0xb   :  { %17 = vsyncpa [#allocation3], 0  ;;  %v43_v11 = vld [vmem:[%s676_s2 + $0x8] sm:$0xff]  ;;  %109 = vmatpush.msra.mxu1 %v98_v8  ;;  %v96_v12 = vld [vmem:[%s678_s4 + $0x50] sm:$0xff]  ;;  %vm54_vm0 = vcmask 523264   ;;  %vm149_vm1 = vcmask 261120  }
   0xc   :  { %74 = vmatpush.msra.mxu0 %v44_v9  ;;  %v42_v13 = vld [vmem:[%s676_s2] sm:$0xff]  ;;  %v95_v15 = vld [vmem:[%s678_s4 + $0x48] sm:$0xff]  ;;  %v93_v17 = vld [vmem:[%s678_s4 + $0x38] sm:$0xff]  ;;  %vm329_vm10 = vcmask 7168   ;;  %s430_s17 = smov [#allocation2]  }
   0xd   :  { %110 = vmatpush.msra.mxu1 %v97_v10  ;;  %v536_v14 = vld [vmem:[%s674_s0] sm:$0xff]  ;;  %v92_v18 = vld [vmem:[%s678_s4 + $0x30] sm:$0xff]  ;;  %v555_v19 = vld [vmem:[%s674_s0 + $0x8] sm:$0xff] }
   0xe   :  { %75 = vmatpush.msra.mxu0 %v43_v11  ;;  %v94_v16 = vld [vmem:[%s678_s4 + $0x40] sm:$0xff]  ;;  %v91_v20 = vld [vmem:[%s678_s4 + $0x28] sm:$0xff]  ;;  %v89_v22 = vld [vmem:[%s678_s4 + $0x18] sm:$0xff] }
   0xf   :  { %111 = vmatpush.msra.mxu1 %v96_v12  ;;  %v90_v21 = vld [vmem:[%s678_s4 + $0x20] sm:$0xff]  ;;  %v88_v23 = vld [vmem:[%s678_s4 + $0x10] sm:$0xff]  ;;  %v87_v24 = vld [vmem:[%s678_s4 + $0x8] sm:$0xff] }
  0x10   :  { %76 = vmatpush.msra.mxu0 %v42_v13  ;;  %v86_v25 = vld [vmem:[%s678_s4] sm:$0xff]  ;;  %s426_s4 = smov 32   ;;  %v155_v46 = vld [vmem:[%s680_s6 + $0x18] sm:$0xff]  ;;  %v154_v47 = vld [vmem:[%s680_s6 + $0x10] sm:$0xff] }
  0x11   :  { %373 = vmatmul.msk.f32.vlgmr.msra.gmra.mxu0 %vm54_vm0, %v536_v14  ;;  %112 = vmatpush.msra.mxu1 %v95_v15  ;;  %v392_v26 = vld [vmem:[%s677_s3] ss:$0 sm:$0xff]  ;;  %s427_s3 = smov 96   ;;  %v153_v48 = vld [vmem:[%s680_s6 + $0x8] sm:$0xff]  ;;  %v206_v4 = vld [vmem:[%s682_s8 + $0x78] sm:$0xff] }
  0x12   :  { %v393_v33 = vld [vmem:[%s679_s5] ss:$0 sm:$0xff]  ;;  %178 = vmatpush.msra.mxu2 %v155_v46  ;;  %v41_v0 = vld [vmem:[%s675_s1 + $0x8] sm:$0xff]  ;;  %v205_v5 = vld [vmem:[%s682_s8 + $0x70] sm:$0xff]  ;;  %211 = vmatpush.msra.mxu3 %v206_v4  ;;  %s361_s5 = sshll.u32 %s685_s11, 4  ;;  %s362_s5 = int_to_ptr.hbm [resolvable:$true] %s361_s5 }
  0x13   :  { %113 = vmatpush.msra.mxu1 %v94_v16  ;;  %v152_v49 = vld [vmem:[%s680_s6] sm:$0xff]  ;;  %v204_v6 = vld [vmem:[%s682_s8 + $0x68] sm:$0xff]  ;;  %v202_v8 = vld [vmem:[%s682_s8 + $0x58] sm:$0xff] }
  0x14   :  { %179 = vmatpush.msra.mxu2 %v154_v47  ;;  %v40_v56 = vld [vmem:[%s675_s1] sm:$0xff]  ;;  %212 = vmatpush.msra.mxu3 %v205_v5  ;;  %v201_v9 = vld [vmem:[%s682_s8 + $0x50] sm:$0xff]  ;;  %v200_v10 = vld [vmem:[%s682_s8 + $0x48] sm:$0xff] }
  0x15   :  { %114 = vmatpush.msra.mxu1 %v93_v17  ;;  %v203_v7 = vld [vmem:[%s682_s8 + $0x60] sm:$0xff]  ;;  %v198_v12 = vld [vmem:[%s682_s8 + $0x38] sm:$0xff]  ;;  %v197_v13 = vld [vmem:[%s682_s8 + $0x30] sm:$0xff] }
  0x16   :  { %180 = vmatpush.msra.mxu2 %v153_v48  ;;  %213 = vmatpush.msra.mxu3 %v204_v6  ;;  %v199_v11 = vld [vmem:[%s682_s8 + $0x40] sm:$0xff]  ;;  %v196_v15 = vld [vmem:[%s682_s8 + $0x28] sm:$0xff] }
  0x17   :  { %115 = vmatpush.msra.mxu1 %v92_v18  ;;  %v195_v16 = vld [vmem:[%s682_s8 + $0x20] sm:$0xff]  ;;  %v194_v18 = vld [vmem:[%s682_s8 + $0x18] sm:$0xff] }
  0x18   :  { %181 = vmatpush.msra.mxu2 %v152_v49  ;;  %214 = vmatpush.msra.mxu3 %v203_v7 }
  0x19   :  { %374 = vmatmul.msk.f32.gmra.mxu0 %vm54_vm0, %v555_v19  ;;  %116 = vmatpush.msra.mxu1 %v91_v20 }
  0x1a   :  { %215 = vmatpush.msra.mxu3 %v202_v8 }
  0x1b   :  { %117 = vmatpush.msra.mxu1 %v90_v21 }
  0x1c   :  { %216 = vmatpush.msra.mxu3 %v201_v9 }
  0x1d   :  { %118 = vmatpush.msra.mxu1 %v89_v22 }
  0x1e   :  { %217 = vmatpush.msra.mxu3 %v200_v10 }
  0x1f   :  { %119 = vmatpush.msra.mxu1 %v88_v23  ;;  %v193_v23 = vld [vmem:[%s682_s8 + $0x10] sm:$0xff] }
  0x20   :  { %218 = vmatpush.msra.mxu3 %v199_v11 }
  0x21   :  { %120 = vmatpush.msra.mxu1 %v87_v24  ;;  %v192_v24 = vld [vmem:[%s682_s8 + $0x8] sm:$0xff] }
  0x22   :  { %219 = vmatpush.msra.mxu3 %v198_v12 }
  0x23   :  { %121 = vmatpush.msra.mxu1 %v86_v25  ;;  %v191_v25 = vld [vmem:[%s682_s8] sm:$0xff] }
  0x24   :  { %220 = vmatpush.msra.mxu3 %v197_v13  ;;  %v428_v13 = vmov 1024.0  }
  0x26   :  { %221 = vmatpush.msra.mxu3 %v196_v15  ;;  %v429_v15 = vmov 16.0  }
  0x28   :  { %222 = vmatpush.msra.mxu3 %v195_v16 }
  0x2a   :  { %223 = vmatpush.msra.mxu3 %v194_v18 }
  0x2c   :  { %224 = vmatpush.msra.mxu3 %v193_v23 }
  0x2e   :  { %225 = vmatpush.msra.mxu3 %v192_v24 }
  0x30   :  { %226 = vmatpush.msra.mxu3 %v191_v25 }
  0x8e   :  { %v78_v27 = vpop.f32.mrf.mxu0 }
  0x8f   :  { %v79_v28 = vadd.f32 %v392_v26, %v78_v27 }
  0x91   :  { %v84_v29 = vmax.f32 %v79_v28, 0.0 }
  0x93   :  { %122 = vmatmul.f32.vlgmr.msra.gmra.mxu1 %v84_v29 }
  0x96   :  { %v81_v30 = vpop.f32.mrf.mxu0 }
  0x97   :  { %v82_v31 = vadd.f32 %v392_v26, %v81_v30  ;;  %v394_v26 = vld [vmem:[%s681_s7] ss:$0 sm:$0xff] }
  0x99   :  { %v85_v32 = vmax.f32 %v82_v31, 0.0 }
  0x9b   :  { %125 = vmatmul.f32.gmra.mxu1 %v85_v32 }
 0x110   :  { %v123_v34 = vpop.f32.mrf.mxu1 }
 0x111   :  { %v124_v35 = vadd.f32 %v393_v33, %v123_v34 }
 0x113   :  { %v278_v36 = vmul.f32 %v124_v35, %v124_v35  ;;  %v129_v37 = vmul.f32 0.5, %v124_v35  ;;  %v276_v50 = vadd.f32 1.0, %v124_v35 }
 0x115   :  { %282 = vrot.lane.b32.xlu1 %v278_v36, %s426_s4  ;;  %v131_v38 = vmul.f32 1.442695, %v129_v37 }
 0x117   :  { %396 = vpow2.f32 %v131_v38 }
 0x118   :  { %v126_v39 = vpop.f32.mrf.mxu1 }
 0x119   :  { %v127_v40 = vadd.f32 %v393_v33, %v126_v39  ;;  %v395_v33 = vld [vmem:[%s683_s9] ss:$0 sm:$0xff] }
 0x11b   :  { %v130_v41 = vmul.f32 0.5, %v127_v40  ;;  %v279_v42 = vmul.f32 %v127_v40, %v127_v40  ;;  %v277_v55 = vadd.f32 1.0, %v127_v40 }
 0x11d   :  { %v397_v43 = vpop.eup %396  ;;  %v133_v44 = vmul.f32 1.442695, %v130_v41  ;;  %284 = vrot.lane.b32.xlu1 %v279_v42, %s426_s4 }
 0x11e   :  { %139 = vrot.lane.b32.xlu0 %v397_v43, %s427_s3  ;;  %v135_v53 = vmul.f32 %v397_v43, %v397_v43 }
 0x11f   :  { %398 = vpow2.f32 %v133_v44 }
 0x125   :  { %v399_v45 = vpop.eup %398 }
 0x126   :  { %141 = vrot.lane.b32.xlu0 %v399_v45, %s427_s3  ;;  %v136_v58 = vmul.f32 %v399_v45, %v399_v45 }
 0x187   :  { %v283_v51 = vpop.permute.xlu1 %282 }
 0x188   :  { %v288_v52 = vsub.f32 %v276_v50, %v283_v51 }
 0x18a   :  { %v290_v54 = vsub.f32 %v288_v52, %v135_v53 }
 0x18c   :  { %294 = vrot.lane.b32.xlu2 %v290_v54, %s427_s3 }
 0x18f   :  { %v285_v57 = vpop.permute.xlu1 %284 }
 0x190   :  { %v289_v59 = vsub.f32 %v277_v55, %v285_v57  ;;  %v140_v60 = vpop.permute.xlu0 %139 }
 0x191   :  { %v145_v61 = vmul.f32 %v140_v60, %v40_v56 }
 0x192   :  { %v291_v62 = vsub.f32 %v289_v59, %v136_v58 }
 0x193   :  { %v147_v63 = vadd.f32 %v145_v61, %v124_v35 }
 0x194   :  { %296 = vrot.lane.b32.xlu2 %v291_v62, %s427_s3 }
 0x195   :  { %150 = vst.msk [vmem:[%s684_s10] sm:$0xff] %vm149_vm1, %v147_v63  ;;  %375 = vmatmul.msk.f32.vlgmr.msra.gmra.mxu2 %vm149_vm1, %v147_v63 }
 0x198   :  { %v142_v1 = vpop.permute.xlu0 %141 }
 0x199   :  { %v146_v2 = vmul.f32 %v142_v1, %v41_v0 }
 0x19b   :  { %v148_v3 = vadd.f32 %v146_v2, %v127_v40 }
 0x19d   :  { %151 = vst.msk [vmem:[%s684_s10 + $0x8] sm:$0xff] %vm149_vm1, %v148_v3  ;;  %376 = vmatmul.msk.f32.gmra.mxu2 %vm149_vm1, %v148_v3 }
 0x1e6   :  { %v295_v17 = vpop.permute.xlu2 %294 }
 0x1e7   :  { %v300_v20 = vsel %vm149_vm1, %v295_v17, 0.0 }
 0x1e8   :  { %301 = vadd.xlane.f32.xlu0 %v300_v20 }
 0x1ee   :  { %v297_v21 = vpop.permute.xlu2 %296 }
 0x1ef   :  { %v303_v22 = vsel %vm149_vm1, %v297_v21, 0.0 }
 0x1f0   :  { %304 = vadd.xlane.f32.xlu1 %v303_v22 }
 0x218   :  { %v183_v27 = vpop.f32.mrf.mxu2 }
 0x219   :  { %v184_v28 = vadd.f32 %v394_v26, %v183_v27 }
 0x21b   :  { %v189_v29 = vmax.f32 %v184_v28, 0.0 }
 0x21d   :  { %227 = vmatmul.f32.vlgmr.msra.gmra.mxu3 %v189_v29 }
 0x220   :  { %v186_v30 = vpop.f32.mrf.mxu2 }
 0x221   :  { %v187_v31 = vadd.f32 %v394_v26, %v186_v30 }
 0x223   :  { %v190_v32 = vmax.f32 %v187_v31, 0.0 }
 0x225   :  { %230 = vmatmul.f32.gmra.mxu3 %v190_v32 }
 0x25b   :  { %v302_v7 = vpop.xlane.xlu0 %301 }
 0x25c   :  { %v306_v10 = vmul.f32 -0.5, %v302_v7 }
 0x25e   :  { %v330_v11 = vsel %vm329_vm10, %v306_v10, 0.0 }
 0x263   :  { %v305_v4 = vpop.xlane.xlu1 %304 }
 0x264   :  { %v307_v9 = vmul.f32 -0.5, %v305_v4 }
 0x2a0   :  { %v228_v34 = vpop.f32.mrf.mxu3 }
 0x2a1   :  { %v229_v35 = vadd.f32 %v395_v33, %v228_v34 }
 0x2a3   :  { %v377_v36 = vmul.f32 -1.442695, %v229_v35 }
 0x2a5   :  { %400 = vpow2.f32 %v377_v36 }
 0x2a8   :  { %v231_v37 = vpop.f32.mrf.mxu3 }
 0x2a9   :  { %v232_v38 = vadd.f32 %v395_v33, %v231_v37 }
 0x2ab   :  { %v401_v39 = vpop.eup %400  ;;  %v378_v40 = vmul.f32 -1.442695, %v232_v38 }
 0x2ac   :  { %v240_v41 = vadd.f32 1.0, %v401_v39 }
 0x2ad   :  { %402 = vpow2.f32 %v378_v40 }
 0x2ae   :  { %404 = vrcp.f32 %v240_v41  ;;  %v253_v48 = vand.u32 2147483648, %v240_v41  ;;  %vm247_vm3 = vweird.f32 %v240_v41  ;;  %v251_v50 = vand.u32 2147483647, %v240_v41 }
 0x2b0   :  { %v254_v54 = vor.u32 1.1754944e-38, %v253_v48  ;;  %vm252_vm5 = vcmp.eq.f32.partialorder %v251_v50, 8.507059e+37 }
 0x2b3   :  { %v403_v42 = vpop.eup %402 }
 0x2b4   :  { %v405_v43 = vpop.eup %404  ;;  %v241_v44 = vadd.f32 1.0, %v403_v42 }
 0x2b5   :  { %v243_v45 = vmul.f32 %v405_v43, %v240_v41  ;;  %vm248_vm2 = vweird.f32 %v405_v43 }
 0x2b6   :  { %406 = vrcp.f32 %v241_v44  ;;  %vm249_vm4 = vmor %vm247_vm3, %vm248_vm2  ;;  %v268_v57 = vand.u32 2147483648, %v241_v44  ;;  %v266_v59 = vand.u32 2147483647, %v241_v44  ;;  %vm262_vm7 = vweird.f32 %v241_v44 }
 0x2b7   :  { %v244_v46 = vsub.f32 1.0, %v243_v45  ;;  %408 = vrcp.f32 %v428_v13 }
 0x2b8   :  { %v269_v62 = vor.u32 1.1754944e-38, %v268_v57  ;;  %vm267_vm9 = vcmp.eq.f32.partialorder %v266_v59, 8.507059e+37  ;;  %410 = vrcp.f32 %v429_v15 }
 0x2b9   :  { %v245_v47 = vmul.f32 %v405_v43, %v244_v46 }
 0x2bb   :  { %v246_v49 = vadd.f32 %v405_v43, %v245_v47 }
 0x2bc   :  { %v407_v51 = vpop.eup %406 }
 0x2bd   :  { %v258_v52 = vmul.f32 %v407_v51, %v241_v44  ;;  %v250_v53 = vsel %vm249_vm4, %v405_v43, %v246_v49  ;;  %vm263_vm6 = vweird.f32 %v407_v51 }
 0x2be   :  { %v255_v56 = vsel %vm252_vm5, %v254_v54, %v250_v53  ;;  %vm264_vm8 = vmor %vm262_vm7, %vm263_vm6 }
 0x2bf   :  { %v259_v55 = vsub.f32 1.0, %v258_v52  ;;  %v272_v61 = vsub.f32 %v255_v56, %v536_v14  ;;  %v331_v14 = vsel %vm329_vm10, %v307_v9, 0.0 }
 0x2c0   :  { %v332_v12 = vadd.f32 %v331_v14, %v330_v11 }
 0x2c1   :  { %v260_v58 = vmul.f32 %v407_v51, %v259_v55  ;;  %v274_v2 = vmul.f32 %v272_v61, %v272_v61 }
 0x2c3   :  { %v261_v60 = vadd.f32 %v407_v51, %v260_v58  ;;  %v308_v5 = vsel %vm54_vm0, %v274_v2, 0.0 }
 0x2c5   :  { %v265_v63 = vsel %vm264_vm8, %v407_v51, %v261_v60 }
 0x2c6   :  { %v270_v0 = vsel %vm267_vm9, %v269_v62, %v265_v63 }
 0x2c7   :  { %v273_v1 = vsub.f32 %v270_v0, %v555_v19  ;;  %v409_v19 = vpop.eup %408 }
 0x2c8   :  { %v321_v16 = vmul.f32 1024.0, %v409_v19  ;;  %v411_v18 = vpop.eup %410  ;;  %vm325_vm11 = vweird.f32 %v409_v19 }
 0x2c9   :  { %v275_v3 = vmul.f32 %v273_v1, %v273_v1  ;;  %v343_v24 = vmul.f32 16.0, %v411_v18  ;;  %vm347_vm12 = vweird.f32 %v411_v18 }
 0x2ca   :  { %v322_v17 = vsub.f32 1.0, %v321_v16 }
 0x2cb   :  { %v309_v6 = vsel %vm54_vm0, %v275_v3, 0.0  ;;  %v344_v28 = vsub.f32 1.0, %v343_v24 }
 0x2cc   :  { %v310_v8 = vadd.f32 %v309_v6, %v308_v5  ;;  %v323_v23 = vmul.f32 %v409_v19, %v322_v17 }
 0x2cd   :  { %v345_v35 = vmul.f32 %v411_v18, %v344_v28 }
 0x2ce   :  { %311 = vadd.xlane.f32.xlu2 %v310_v8  ;;  %v324_v27 = vadd.f32 %v409_v19, %v323_v23 }
 0x2cf   :  { %v346_v38 = vadd.f32 %v411_v18, %v345_v35 }
 0x2d0   :  { %v326_v34 = vsel %vm325_vm11, %v409_v19, %v324_v27 }
 0x2d1   :  { %v348_v41 = vsel %vm347_vm12, %v411_v18, %v346_v38 }
 0x2d6   :  { %333 = vadd.xlane.f32.xlu2 %v332_v12 }
 0x341   :  { %v312_v20 = vpop.xlane.xlu2 %311 }
 0x342   :  { %v313_v21 = vrot.slane %v312_v20, 4 }
 0x344   :  { %v314_v22 = vadd.f32 %v313_v21, %v312_v20 }
 0x346   :  { %v315_v25 = vrot.slane %v314_v22, 2 }
 0x348   :  { %v316_v26 = vadd.f32 %v315_v25, %v314_v22 }
 0x349   :  { %v334_v29 = vpop.xlane.xlu2 %333 }
 0x34a   :  { %v335_v30 = vrot.slane %v334_v29, 4  ;;  %v317_v31 = vrot.slane %v316_v26, 1 }
 0x34c   :  { %v336_v32 = vadd.f32 %v335_v30, %v334_v29  ;;  %v318_v33 = vadd.f32 %v317_v31, %v316_v26 }
 0x34e   :  { %v337_v36 = vrot.slane %v336_v32, 2  ;;  %379 = vpush %v318_v33 }
 0x34f   :  { %381 = vpush %v326_v34 }
 0x350   :  { %v338_v37 = vadd.f32 %v337_v36, %v336_v32 }
 0x352   :  { %v339_v39 = vrot.slane %v338_v37, 1 }
 0x354   :  { %v340_v40 = vadd.f32 %v339_v39, %v338_v37 }
 0x356   :  { %383 = vpush %v340_v40 }
 0x357   :  { %385 = vpush %v348_v41 }
 0x37f   :  { %s380_s7 = spop %379 }
 0x380   :  { %s382_s8 = spop %381 }
 0x381   :  { %s328_s13 = smul.f32 %s382_s8, %s380_s7 }
 0x387   :  { %s384_s9 = spop %383 }
 0x388   :  { %s386_s14 = spop %385 }
 0x389   :  { %s350_s15 = smul.f32 %s386_s14, %s384_s9 }
 0x38b   :  { %s351_s16 = sadd.f32 %s350_s15, %s328_s13 }
 0x38d   :  { %353 = sst [smem:[#allocation2]] %s351_s16 }
 0x38e   :  { %364 = dma.smem_to_hbm %s430_s17, 16, %s362_s5, [#allocation3]  }
 0x38f   :  { %424 = dma.done.wait [#allocation3], 16  }
 0x390   :  { %425 = vsyncadd [#allocation3], 4294967280 }
 0x391   :  { %371 = sfence }
 0x392   :  { %372 = vsyncpa [#allocation3], 1 }

</bundles_post_ra>
